<compile_context>
chip_gen: v5e
topology: v5e:2x2
jax: 0.10.0
libtpu: 0.0.40
codegen_flags: <defaults>
</compile_context>

<pallas_src>
import jax
import jax.numpy as jnp
from jax.experimental import pallas as pl
from jax.experimental.pallas import tpu as pltpu


def _head_kernel(x_ref, w1_ref, b1_ref, w2_ref, b2_ref, o_ref):
    # dense: bf16 matmul on the MXU with f32 accumulation.
    h = jnp.dot(x_ref[...], w1_ref[...], preferred_element_type=jnp.float32)
    # bias add + tanh in f32 (VPU/EUP).
    h = jnp.tanh(h + b1_ref[...])
    # out_proj: bf16 matmul, f32 accumulation, f32 bias add.
    y = jnp.dot(h.astype(w2_ref.dtype), w2_ref[...],
                preferred_element_type=jnp.float32)
    o_ref[...] = (y + b2_ref[...]).astype(o_ref.dtype)


def _round_up(n, m):
    return ((n + m - 1) // m) * m


def adaptive_classification_head(x, dense_w, dense_b, out_w, out_b,
                                 *, compute_dtype=jnp.bfloat16):
    """Forward pass of AdaptiveClassificationHead(RobertaClassificationHead).

    x:        (B, H) float32
    dense_w:  (H, H)  -- (in, out) layout, i.e. transposed vs torch.nn.Linear
    dense_b:  (H,)
    out_w:    (H, L)  -- (in, out) layout
    out_b:    (L,)
    returns:  squeezed (B, L) float32 logits (size-1 dims removed, as torch)
    """
    B, H = x.shape
    L = out_w.shape[1]

    # Batch tile: 256 rows fills the 2x256x256 MXU on v6e/v7x; tiny batches
    # just round up to the 8-row sublane granule.
    TB = min(256, _round_up(B, 8))
    B_pad = _round_up(B, TB)
    # Lane-dense output: pad num_labels to a full 128-lane vreg width so the
    # store is an unmasked vst, then slice afterwards.
    L_pad = _round_up(L, 128)

    cdt = jnp.dtype(compute_dtype)

    # Pad / cast inputs in the wrapper. Padded rows/cols are zero, so the
    # extra work produces finite garbage that is sliced away below.
    x_p = jnp.zeros((B_pad, H), cdt).at[:B, :].set(x.astype(cdt))
    w1 = dense_w.astype(cdt)
    b1 = dense_b.astype(jnp.float32).reshape(1, H)
    w2 = jnp.zeros((H, L_pad), cdt).at[:, :L].set(out_w.astype(cdt))
    b2 = jnp.zeros((1, L_pad), jnp.float32).at[:, :L].set(
        out_b.astype(jnp.float32).reshape(1, L))

    grid = (B_pad // TB,)

    cost = pl.CostEstimate(
        flops=2 * B_pad * H * (H + L_pad),
        transcendentals=B_pad * H,
        bytes_accessed=(B_pad * H * cdt.itemsize          # x
                        + H * H * cdt.itemsize            # W1
                        + H * L_pad * cdt.itemsize        # W2
                        + (H + L_pad) * 4                 # biases (f32)
                        + B_pad * L_pad * 4))             # output (f32)

    out = pl.pallas_call(
        _head_kernel,
        out_shape=jax.ShapeDtypeStruct((B_pad, L_pad), jnp.float32),
        grid_spec=pl.GridSpec(
            grid=grid,
            in_specs=[
                # Activations: tiled over the batch grid axis.
                pl.BlockSpec((TB, H), lambda i: (i, 0)),
                # Weights / biases: constant index maps -> VMEM-resident.
                pl.BlockSpec((H, H), lambda i: (0, 0)),
                pl.BlockSpec((1, H), lambda i: (0, 0)),
                pl.BlockSpec((H, L_pad), lambda i: (0, 0)),
                pl.BlockSpec((1, L_pad), lambda i: (0, 0)),
            ],
            out_specs=pl.BlockSpec((TB, L_pad), lambda i: (i, 0)),
        ),
        compiler_params=pltpu.CompilerParams(
            # Independent batch tiles -> shard across both TCs on v7x.
            dimension_semantics=("parallel",)),
        cost_estimate=cost,
    )(x_p, w1, b1, w2, b2)

    # Drop padding, then torch's .squeeze(): remove all size-1 dims.
    return jnp.squeeze(out[:B, :L])


def _reference(x, dense_w, dense_b, out_w, out_b):
    h = jnp.tanh(x @ dense_w + dense_b)
    y = h @ out_w + out_b
    return jnp.squeeze(y)


if __name__ == "__main__":
    key = jax.random.PRNGKey(0)
    B, H, L = 2, 32, 2   # small batch, hidden_size, num_labels

    k1, k2, k3, k4, k5 = jax.random.split(key, 5)
    x = jax.random.normal(k1, (B, H), dtype=jnp.float32)
    dense_w = jax.random.normal(k2, (H, H), dtype=jnp.float32) * 0.1
    dense_b = jax.random.normal(k3, (H,), dtype=jnp.float32) * 0.1
    out_w = jax.random.normal(k4, (H, L), dtype=jnp.float32) * 0.1
    out_b = jax.random.normal(k5, (L,), dtype=jnp.float32) * 0.1

    out = adaptive_classification_head(x, dense_w, dense_b, out_w, out_b)
    out = jax.block_until_ready(out)

    ref = _reference(x, dense_w, dense_b, out_w, out_b)
    assert out.shape == ref.shape, (out.shape, ref.shape)
    # bf16 MXU inputs with f32 accumulation -> loosened tolerance vs f32 ref.
    assert jnp.allclose(out, ref, atol=2e-2, rtol=2e-2), (
        float(jnp.max(jnp.abs(out - ref))))

    print("KERNEL_OK")
</pallas_src>

<mosaic_0001>
module attributes {stable_mosaic.version = 11 : i64} {
  func.func @_head_kernel(%arg0: i32, %arg1: memref<8x32xbf16, #tpu.memory_space<vmem>>, %arg2: memref<32x32xbf16, #tpu.memory_space<vmem>>, %arg3: memref<1x32xf32, #tpu.memory_space<vmem>>, %arg4: memref<32x128xbf16, #tpu.memory_space<vmem>>, %arg5: memref<1x128xf32, #tpu.memory_space<vmem>>, %arg6: memref<8x128xf32, #tpu.memory_space<vmem>>) attributes {dimension_semantics = [#tpu.dimension_semantics<parallel>], iteration_bounds = array<i64: 1>, scalar_prefetch = 0 : i64, scratch_operands = 0 : i64, tpu.core_type = #tpu.core_type<tc>, window_params = [{transform_indices = @transform_0, window_bounds = array<i64: 8, 32>}, {pipeline_mode = #tpu.pipeline_mode<synchronous>, transform_indices = @transform_1, window_bounds = array<i64: 32, 32>}, {pipeline_mode = #tpu.pipeline_mode<synchronous>, transform_indices = @transform_2, window_bounds = array<i64: 1, 32>}, {pipeline_mode = #tpu.pipeline_mode<synchronous>, transform_indices = @transform_3, window_bounds = array<i64: 32, 128>}, {pipeline_mode = #tpu.pipeline_mode<synchronous>, transform_indices = @transform_4, window_bounds = array<i64: 1, 128>}, {transform_indices = @transform_5, window_bounds = array<i64: 8, 128>}]} {
    %c0 = arith.constant 0 : index
    %c0_0 = arith.constant 0 : index
    %0 = vector.load %arg1[%c0, %c0_0] : memref<8x32xbf16, #tpu.memory_space<vmem>>, vector<8x32xbf16>
    %c0_1 = arith.constant 0 : index
    %c0_2 = arith.constant 0 : index
    %1 = vector.load %arg2[%c0_1, %c0_2] : memref<32x32xbf16, #tpu.memory_space<vmem>>, vector<32x32xbf16>
    %cst = arith.constant dense<0.000000e+00> : vector<8x32xf32>
    %2 = tpu.matmul %0, %1, %cst {dimension_numbers = #tpu.dot_dimension_numbers<[1], [0], [0], [1], [0, 0, 1, 1], [], []>} : vector<8x32xbf16>, vector<32x32xbf16>, vector<8x32xf32> -> vector<8x32xf32>
    %c0_3 = arith.constant 0 : index
    %c0_4 = arith.constant 0 : index
    %3 = vector.load %arg3[%c0_3, %c0_4] : memref<1x32xf32, #tpu.memory_space<vmem>>, vector<1x32xf32>
    %4 = vector.broadcast %3 : vector<1x32xf32> to vector<8x32xf32>
    %5 = arith.addf %2, %4 : vector<8x32xf32>
    %6 = math.tanh %5 : vector<8x32xf32>
    %7 = arith.truncf %6 : vector<8x32xf32> to vector<8x32xbf16>
    %c0_5 = arith.constant 0 : index
    %c0_6 = arith.constant 0 : index
    %8 = vector.load %arg4[%c0_5, %c0_6] : memref<32x128xbf16, #tpu.memory_space<vmem>>, vector<32x128xbf16>
    %cst_7 = arith.constant dense<0.000000e+00> : vector<8x128xf32>
    %9 = tpu.matmul %7, %8, %cst_7 {dimension_numbers = #tpu.dot_dimension_numbers<[1], [0], [0], [1], [0, 0, 1, 1], [], []>} : vector<8x32xbf16>, vector<32x128xbf16>, vector<8x128xf32> -> vector<8x128xf32>
    %c0_8 = arith.constant 0 : index
    %c0_9 = arith.constant 0 : index
    %10 = vector.load %arg5[%c0_8, %c0_9] : memref<1x128xf32, #tpu.memory_space<vmem>>, vector<1x128xf32>
    %11 = vector.broadcast %10 : vector<1x128xf32> to vector<8x128xf32>
    %12 = arith.addf %9, %11 : vector<8x128xf32>
    %c0_10 = arith.constant 0 : index
    %c0_11 = arith.constant 0 : index
    %13 = vector.load %arg6[%c0_10, %c0_11] : memref<8x128xf32, #tpu.memory_space<vmem>>, vector<8x128xf32>
    tpu.vector_store %arg6[%c0_10, %c0_11], %12 {strides = array<i32>} : memref<8x128xf32, #tpu.memory_space<vmem>>, vector<8x128xf32>,
    return
  }
  func.func @transform_0(%arg0: i32) -> (i32, i32) {
    %c0_i32 = arith.constant 0 : i32
    %c0_i32_0 = arith.constant 0 : i32
    return %arg0, %c0_i32 : i32, i32
  }
  func.func @transform_1(%arg0: i32) -> (i32, i32) {
    %c0_i32 = arith.constant 0 : i32
    %c0_i32_0 = arith.constant 0 : i32
    %c0_i32_1 = arith.constant 0 : i32
    return %c0_i32, %c0_i32_0 : i32, i32
  }
  func.func @transform_2(%arg0: i32) -> (i32, i32) {
    %c0_i32 = arith.constant 0 : i32
    %c0_i32_0 = arith.constant 0 : i32
    %c0_i32_1 = arith.constant 0 : i32
    return %c0_i32, %c0_i32_0 : i32, i32
  }
  func.func @transform_3(%arg0: i32) -> (i32, i32) {
    %c0_i32 = arith.constant 0 : i32
    %c0_i32_0 = arith.constant 0 : i32
    %c0_i32_1 = arith.constant 0 : i32
    return %c0_i32, %c0_i32_0 : i32, i32
  }
  func.func @transform_4(%arg0: i32) -> (i32, i32) {
    %c0_i32 = arith.constant 0 : i32
    %c0_i32_0 = arith.constant 0 : i32
    %c0_i32_1 = arith.constant 0 : i32
    return %c0_i32, %c0_i32_0 : i32, i32
  }
  func.func @transform_5(%arg0: i32) -> (i32, i32) {
    %c0_i32 = arith.constant 0 : i32
    %c0_i32_0 = arith.constant 0 : i32
    return %arg0, %c0_i32 : i32, i32
  }
}

</mosaic_0001>

<bundles_post_ra>
// kernel: tpu_custom_call.1
= control target key start
LH: loop header
LB: loop body
LE: loop exit
PB: predicated region body
PF: predicated region fallthrough
CT: control target
= control target key end

     0   :  { %10 = vsyncpa [#allocation3], 0  ;;  %s350_s0 = inlined_call_operand.hbm [shape: bf16[8,32], index: 0, kind: input, shape index: {}]   ;;  %s351_s1 = inlined_call_operand.hbm [shape: bf16[32,32], index: 1, kind: input, shape index: {}]   ;;  %s352_s2 = inlined_call_operand.vmem [shape: f32[1,32], index: 2, kind: input, shape index: {}]   ;;  %s353_s3 = inlined_call_operand.hbm [shape: bf16[32,128], index: 3, kind: input, shape index: {}]   ;;  %s354_s4 = inlined_call_operand.vmem [shape: f32[1,128], index: 4, kind: input, shape index: {}]   ;;  %s355_s5 = inlined_call_operand.hbm [shape: f32[8,128], index: 5, kind: output, shape index: {}]  }
   0x1   :  { %11 = vsyncpa [#allocation6], 0  ;;  %s28_s20 = sshll.u32 %s351_s1, 4  ;;  %s29_s20 = int_to_ptr.hbm [resolvable:$true] %s28_s20 }
   0x2   :  { %12 = vsyncpa [#allocation4], 0  ;;  %s296_s21 = smov [#allocation5]   ;;  %s18_s25 = sshll.u32 %s350_s0, 4  ;;  %s19_s25 = int_to_ptr.hbm [resolvable:$true] %s18_s25 }
   0x3   :  { %s30_s22 = sshll.u32 %s296_s21, 4  ;;  %s297_s26 = smov 64   ;;  %s31_s22 = int_to_ptr.vmem [resolvable:$true] %s30_s22 }
   0x4   :  { %s298_s27 = smov 4   ;;  %s299_s28 = smov [#allocation2]  }
   0x5   :  { %36 = dma.hbm_to_vmem [thread:$0]  %s29_s20, 256, %s31_s22, [#allocation6], %s297_s26, %s297_s26, %s298_s27  }
   0x6   :  { %s20_s29 = sshll.u32 %s299_s28, 4  ;;  %s43_s7 = sshll.u32 %s353_s3, 4  ;;  %s21_s29 = int_to_ptr.vmem [resolvable:$true] %s20_s29  ;;  %s44_s7 = int_to_ptr.hbm [resolvable:$true] %s43_s7 }
   0x7   :  { %23 = dma.hbm_to_vmem [thread:$0]  %s19_s25, 64, %s21_s29, [#allocation3]  }
   0x8   :  { %s300_s1 = smov [#allocation7]  }
   0x9   :  { %s45_s8 = sshll.u32 %s300_s1, 4  ;;  %s46_s8 = int_to_ptr.vmem [resolvable:$true] %s45_s8 }
   0xa   :  { %51 = dma.hbm_to_vmem [thread:$0]  %s44_s7, 256, %s46_s8, [#allocation6], %s297_s26, %s297_s26, %s298_s27  }
   0xb   :  { %290 = dma.done.wait [#allocation3], 64  }
   0xc   :  { %291 = vsyncadd [#allocation3], 4294967232 }
   0xd   :  { %292 = dma.done.wait [#allocation6], 512  }
   0xe   :  { %293 = vsyncadd [#allocation6], 4294966784  ;;  %v181_v0 = vld [vmem:[#allocation5 + $0x8] sm:$0xff]  ;;  %v180_v1 = vld [vmem:[#allocation5] sm:$0xff]  ;;  %vm88_vm0 = vcmask 261120   ;;  %s301_s11 = smov [#allocation8]  }
   0xf   :  { %98 = vmatpush.bf16.msra.mxu0 %v181_v0  ;;  %v67_v2 = vld [vmem:[#allocation2] sm:$0xf]  ;;  %v182_v4 = vld [vmem:[#allocation7] sm:$0xff]  ;;  %s149_s12 = sshll.u32 %s301_s11, 4  ;;  %s151_s15 = sshll.u32 %s355_s5, 4  ;;  %s150_s12 = int_to_ptr.vmem [resolvable:$true] %s149_s12  ;;  %s152_s15 = int_to_ptr.hbm [resolvable:$true] %s151_s15 }
  0x10   :  { %v183_v3 = vld [vmem:[#allocation7 + $0x8] sm:$0xff] }
  0x11   :  { %136 = vmatpush.bf16.msra.mxu1 %v183_v3  ;;  %v190_v5 = vld [vmem:[%s352_s2] ss:$0 sm:$0xff] }
  0x12   :  { %v191_v11 = vld [vmem:[%s354_s4] ss:$0 sm:$0xff] }
  0x13   :  { %99 = vmatpush.bf16.msra.mxu0 %v180_v1 }
  0x15   :  { %137 = vmatpush.bf16.msra.mxu1 %v182_v4 }
  0x16   :  { %170 = vmatmul.msk.bf16.vlgmr.msra.gmra.mxu0 %vm88_vm0, %v67_v2 }
  0x93   :  { %v101_v6 = vpop.f32.mrf.mxu0 }
  0x94   :  { %v102_v7 = vadd.f32 %v190_v5, %v101_v6 }
  0x96   :  { %192 = vtanh.f32 %v102_v7 }
  0x9b   :  { %v103_v8 = vpop.f32.mrf.mxu0 }
  0x9c   :  { %v193_v9 = vpop.eup %192 }
  0x9d   :  { %v106_v10 = vpack.c.bf16 %v193_v9, %v193_v9 }
  0x9f   :  { %179 = vmatmul.msk.bf16.vlgmr.msra.gmra.mxu1 %vm88_vm0, %v106_v10 }
 0x11c   :  { %v139_v12 = vpop.f32.mrf.mxu1 }
 0x11d   :  { %v140_v13 = vadd.f32 %v191_v11, %v139_v12 }
 0x11f   :  { %143 = vst [vmem:[#allocation8] sm:$0xff] %v140_v13 }
 0x120   :  { %154 = dma.vmem_to_hbm [thread:$0]  %s150_s12, 128, %s152_s15, [#allocation4]  }
 0x124   :  { %v141_v14 = vpop.f32.mrf.mxu1 }
 0x125   :  { %294 = dma.done.wait [#allocation4], 128  }
 0x126   :  { %295 = vsyncadd [#allocation4], 4294967168 }
 0x127   :  { %159 = vsyncpa [#allocation3], 1 }
 0x128   :  { %160 = vsyncpa [#allocation6], 1 }
 0x129   :  { %161 = vsyncpa [#allocation4], 1 }

</bundles_post_ra>
